<compile_context>
chip_gen: v7x
topology: tpu7x:2x2x1
jax: 0.10.0
libtpu: 0.0.40
codegen_flags: <defaults>
</compile_context>

<pallas_src>
import jax
import jax.numpy as jnp
from jax.experimental import pallas as pl
from jax.experimental.pallas import tpu as pltpu


_LANE = 128
_BLOCK_BYTES = 8 << 20            # per-block data; x4 (in+out, double-buffered) = 32 MiB
_MIN_SPLIT_BLOCK_BYTES = 512 << 10  # only add grid steps if blocks keep >= 512 KiB
_MIN_GRID_STEPS = 4               # lets v7x shard the parallel axis across 2 TCs
_VMEM_LIMIT_BYTES = 40 << 20      # > 4x block footprint, < 64 MiB (v7x physical VMEM)


def _identity_copy_kernel(x_ref, o_ref):
    # Full-tile load + store. With a (sublane, >=128)-lane-dense block this
    # lowers to unmasked vld/vst; the binding resource is HBM bandwidth.
    o_ref[...] = x_ref[...]


def _sublane(dtype) -> int:
    # Packed sublanes per vreg: 8 (32-bit), 16 (16-bit), 32 (8-bit).
    itemsize = jnp.dtype(dtype).itemsize
    return max(8, 32 // max(itemsize, 1))


def identity(x: jax.Array) -> jax.Array:
    """Identity.forward(x). Fastest path: no kernel, no HBM traffic."""
    return x


def identity_pallas(x: jax.Array) -> jax.Array:
    """Identity via an explicit tiled, lane-dense Pallas copy kernel.

    Used when a pallas_call must exist (e.g. as a fusion/benchmark anchor);
    otherwise prefer `identity()` which is free.
    """
    orig_shape = x.shape
    dtype = x.dtype
    n = x.size
    if n == 0:
        return x

    itemsize = jnp.dtype(dtype).itemsize
    sub = _sublane(dtype)

    # Widest lane extent (multiple of 128) that evenly divides n: wider rows
    # -> longer unmasked store runs and bigger DMA descriptors, no padding.
    lane = 0
    for cand in (1024, 512, 256, _LANE):
        if n % cand == 0:
            lane = cand
            break
    if lane == 0:
        # Ragged total size: a pad + slice round-trip would cost ~3x the
        # traffic of a single copy; identity is exact either way, so skip
        # the kernel entirely.
        return x

    rows = n // lane
    row_bytes = lane * itemsize
    slab = x.reshape(rows, lane)  # contiguous reshape, no data movement

    # Row tile: multiple of the packed sublane count, capped by the per-block
    # byte budget (or the whole slab when it is small).
    max_rows = max(sub, (_BLOCK_BYTES // row_bytes) // sub * sub)
    tile_rows = rows if rows <= max_rows else max_rows
    num_blocks = pl.cdiv(rows, tile_rows)

    # Ensure at least _MIN_GRID_STEPS grid steps (v7x megacore sharding) as
    # long as each block still amortizes the ~0.35 us per-step overhead.
    if num_blocks < _MIN_GRID_STEPS:
        cand_rows = -(-rows // _MIN_GRID_STEPS)        # ceil(rows / steps)
        cand_rows = -(-cand_rows // sub) * sub         # round up to sublane multiple
        if 0 < cand_rows < rows and cand_rows * row_bytes >= _MIN_SPLIT_BLOCK_BYTES:
            tile_rows = cand_rows
            num_blocks = pl.cdiv(rows, tile_rows)

    out = pl.pallas_call(
        _identity_copy_kernel,
        out_shape=jax.ShapeDtypeStruct((rows, lane), dtype),
        grid=(num_blocks,),
        in_specs=[pl.BlockSpec((tile_rows, lane), lambda i: (i, 0))],
        out_specs=pl.BlockSpec((tile_rows, lane), lambda i: (i, 0)),
        # No input/output aliasing: on a non-donated input XLA would insert a
        # defensive full copy before the kernel, doubling HBM traffic.
        compiler_params=pltpu.CompilerParams(
            dimension_semantics=("parallel",),
            vmem_limit_bytes=_VMEM_LIMIT_BYTES,
        ),
    )(slab)

    return out.reshape(orig_shape)


if __name__ == "__main__":
    key = jax.random.PRNGKey(0)
    x = jax.random.normal(key, (2, 4, 16, 16), dtype=jnp.float32)

    # Exercise the Pallas copy-kernel path.
    identity_kernel_jit = jax.jit(identity_pallas)
    y = identity_kernel_jit(x)
    jax.block_until_ready(y)

    assert y.shape == x.shape, (y.shape, x.shape)
    assert y.dtype == x.dtype, (y.dtype, x.dtype)
    assert bool(jnp.all(y == x)), "identity (pallas) output mismatch"

    # Zero-traffic short-circuit path (the module's preferred forward).
    z = identity(x)
    assert z.shape == x.shape and z.dtype == x.dtype
    assert bool(jnp.all(z == x)), "identity (short-circuit) output mismatch"

    print("KERNEL_OK")
</pallas_src>

<mosaic_0001>
module attributes {stable_mosaic.version = 11 : i64} {
  func.func @_identity_copy_kernel(%arg0: i32, %arg1: memref<2x1024xf32, #tpu.memory_space<vmem>>, %arg2: memref<2x1024xf32, #tpu.memory_space<vmem>>) attributes {dimension_semantics = [#tpu.dimension_semantics<parallel>], iteration_bounds = array<i64: 1>, scalar_prefetch = 0 : i64, scratch_operands = 0 : i64, tpu.core_type = #tpu.core_type<tc>, window_params = [{transform_indices = @transform_0, window_bounds = array<i64: 2, 1024>}, {transform_indices = @transform_1, window_bounds = array<i64: 2, 1024>}]} {
    %c0 = arith.constant 0 : index
    %c0_0 = arith.constant 0 : index
    %0 = vector.load %arg1[%c0, %c0_0] : memref<2x1024xf32, #tpu.memory_space<vmem>>, vector<2x1024xf32>
    %c0_1 = arith.constant 0 : index
    %c0_2 = arith.constant 0 : index
    %1 = vector.load %arg2[%c0_1, %c0_2] : memref<2x1024xf32, #tpu.memory_space<vmem>>, vector<2x1024xf32>
    tpu.vector_store %arg2[%c0_1, %c0_2], %0 {strides = array<i32>} : memref<2x1024xf32, #tpu.memory_space<vmem>>, vector<2x1024xf32>,
    return
  }
  func.func @transform_0(%arg0: i32) -> (i32, i32) {
    %c0_i32 = arith.constant 0 : i32
    %c0_i32_0 = arith.constant 0 : i32
    return %arg0, %c0_i32 : i32, i32
  }
  func.func @transform_1(%arg0: i32) -> (i32, i32) {
    %c0_i32 = arith.constant 0 : i32
    %c0_i32_0 = arith.constant 0 : i32
    return %arg0, %c0_i32 : i32, i32
  }
}

</mosaic_0001>

<bundles_post_ra>
// kernel: identity_pallas.1
= control target key start
LH: loop header
LB: loop body
LE: loop exit
PB: predicated region body
PF: predicated region fallthrough
CT: control target
= control target key end

     0   :  { %s38_s0 = inlined_call_operand.vmem [shape: f32[2,1024], index: 0, kind: input, shape index: {}]   ;;  %s39_s1 = inlined_call_operand.vmem [shape: f32[2,1024], index: 1, kind: output, shape index: {}]  }
   0x1   :  { %v8_v0 = vld [vmem:[%s38_s0] sm:$0xff]  ;;  %v9_v1 = vld [vmem:[%s38_s0 + $0x8] sm:$0xff] }
   0x2   :  { %10 = vst [vmem:[%s39_s1] sm:$0xff] %v8_v0  ;;  %11 = vst [vmem:[%s39_s1 + $0x8] sm:$0xff] %v9_v1 }

</bundles_post_ra>
